<compile_context>
chip_gen: v5e
topology: v5e:2x2
jax: 0.10.0
libtpu: 0.0.40
codegen_flags: <defaults>
</compile_context>

<pallas_src>
import functools

import jax
import jax.numpy as jnp
from jax.experimental import pallas as pl
from jax.experimental.pallas import tpu as pltpu

Z_DIM = 64
HIDDEN = 256
IMG_DIM = 784          # 28*28, MNIST GAN
LANE = 128             # TPU lane width
BLOCK_B_CAP = 1024     # max rows per grid step (amortizes ~0.35us step cost)


def _round_up(n, m):
    return ((n + m - 1) // m) * m


def _choose_batch_tiling(B, cap=BLOCK_B_CAP):
    """Pick (block_b, b_pad).

    Prefers b_pad == round_up(B, 8) (no extra wrapper-side batch padding) and
    >= 2 grid steps when the batch allows it, so the 'parallel' grid axis can
    shard across both TensorCores on v7x. Tiles are capped at `cap` rows.
    """
    b8 = _round_up(max(B, 1), 8)
    if b8 % 16 == 0 and b8 // 2 >= 8:
        block_b = min(b8 // 2, cap)   # >= 2 steps, each a multiple of 8
    else:
        block_b = min(b8, cap)        # tiny/odd batch: single step
    b_pad = _round_up(b8, block_b)
    return block_b, b_pad


def _generator_kernel(x_ref, w1_ref, b1_ref, w2_ref, b2_ref, out_ref):
    # Layer 1: [TB, z]bf16 @ [z, 256]bf16 -> f32 acc, + bias (f32).
    h = jnp.dot(x_ref[...], w1_ref[...], preferred_element_type=jnp.float32)
    h = h + b1_ref[...]
    # LeakyReLU(negative_slope=0.1) — matches nn.LeakyReLU(0.1) in the module.
    h = jnp.where(h >= 0.0, h, 0.1 * h)
    # Layer 2: [TB, 256]bf16 @ [256, N_pad]bf16 -> f32 acc, + bias (f32).
    o = jnp.dot(h.astype(w2_ref.dtype), w2_ref[...],
                preferred_element_type=jnp.float32)
    o = o + b2_ref[...]
    # Tanh on f32, store bf16 (lane-dense N_pad columns; padded cols exactly 0).
    out_ref[...] = jnp.tanh(o).astype(out_ref.dtype)


def prepare_params(w1, b1, w2, b2):
    """One-time param conversion (do NOT call per training step):
    bf16 weights, f32 biases, second layer padded to a lane-dense width."""
    z, hidden = w1.shape
    _, img_dim = w2.shape
    n_pad = _round_up(img_dim, LANE)

    w1b = jnp.asarray(w1, jnp.bfloat16)
    w2b = jnp.asarray(w2, jnp.bfloat16)
    b1f = jnp.asarray(b1, jnp.float32).reshape(1, hidden)
    b2f = jnp.asarray(b2, jnp.float32).reshape(1, img_dim)
    if n_pad != img_dim:
        w2b = jnp.pad(w2b, ((0, 0), (0, n_pad - img_dim)))  # zero columns
        b2f = jnp.pad(b2f, ((0, 0), (0, n_pad - img_dim)))  # zero bias
    return (w1b, b1f, w2b, b2f), img_dim


def generator_forward(x, params, img_dim=IMG_DIM):
    """x: [B, z_dim] float32 -> [B, img_dim] bfloat16 (upcast in the consumer
    only if it truly needs f32)."""
    w1b, b1f, w2b, b2f = params
    B, z = x.shape
    hidden = w1b.shape[1]
    n_pad = w2b.shape[1]

    block_b, b_pad = _choose_batch_tiling(B)

    xb = x.astype(jnp.bfloat16)
    if b_pad != B:
        xb = jnp.pad(xb, ((0, b_pad - B), (0, 0)))

    grid = (b_pad // block_b,)

    flops = 2 * b_pad * (z * hidden + hidden * n_pad)
    transcendentals = b_pad * n_pad  # tanh
    bytes_accessed = (xb.size * 2 + w1b.size * 2 + w2b.size * 2
                      + b1f.size * 4 + b2f.size * 4
                      + b_pad * n_pad * 2)  # bf16 output writeback

    out = pl.pallas_call(
        _generator_kernel,
        out_shape=jax.ShapeDtypeStruct((b_pad, n_pad), jnp.bfloat16),
        grid_spec=pltpu.PrefetchScalarGridSpec(
            num_scalar_prefetch=0,
            grid=grid,
            in_specs=[
                # x: tiled over batch (double-buffered DMA overlaps compute)
                pl.BlockSpec((block_b, z), lambda i: (i, 0)),
                # weights / biases: constant block index -> resident in VMEM
                pl.BlockSpec((z, hidden), lambda i: (0, 0)),
                pl.BlockSpec((1, hidden), lambda i: (0, 0)),
                pl.BlockSpec((hidden, n_pad), lambda i: (0, 0)),
                pl.BlockSpec((1, n_pad), lambda i: (0, 0)),
            ],
            out_specs=pl.BlockSpec((block_b, n_pad), lambda i: (i, 0)),
        ),
        compiler_params=pltpu.CompilerParams(
            # batch axis is embarrassingly parallel -> megacore sharding on v7x
            dimension_semantics=("parallel",),
            # Actual need at block_b=1024 is ~5 MiB (weights resident + 2x
            # double-buffered bf16 tiles); 32 MiB covers it with headroom and
            # stays within every generation's physical VMEM.
            vmem_limit_bytes=32 << 20,
        ),
        cost_estimate=pl.CostEstimate(
            flops=flops,
            transcendentals=transcendentals,
            bytes_accessed=bytes_accessed,
        ),
    )(xb, w1b, b1f, w2b, b2f)

    # Crop only when there is actually padding to drop (column crop 896->784
    # is always needed for module-equivalent output; batch crop usually not).
    if b_pad != B or n_pad != img_dim:
        out = out[:B, :img_dim]
    return out


def init_params(key, z_dim=Z_DIM, hidden=HIDDEN, img_dim=IMG_DIM):
    k1, k2, k3, k4 = jax.random.split(key, 4)
    # PyTorch-like uniform init: U(-1/sqrt(fan_in), 1/sqrt(fan_in)).
    lim1 = 1.0 / jnp.sqrt(z_dim)
    lim2 = 1.0 / jnp.sqrt(hidden)
    w1 = jax.random.uniform(k1, (z_dim, hidden), jnp.float32, -lim1, lim1)
    b1 = jax.random.uniform(k2, (1, hidden), jnp.float32, -lim1, lim1)
    w2 = jax.random.uniform(k3, (hidden, img_dim), jnp.float32, -lim2, lim2)
    b2 = jax.random.uniform(k4, (1, img_dim), jnp.float32, -lim2, lim2)
    return w1, b1, w2, b2


if __name__ == "__main__":
    key = jax.random.PRNGKey(0)
    k_params, k_x = jax.random.split(key)

    batch = 8  # small demo batch; tiling adapts, no wasted padded rows
    w1, b1, w2, b2 = init_params(k_params)
    params, img_dim = prepare_params(w1, b1, w2, b2)  # one-time cast/pad
    x = jax.random.normal(k_x, (batch, Z_DIM), jnp.float32)

    fwd = jax.jit(functools.partial(generator_forward, img_dim=img_dim))
    out = jax.block_until_ready(fwd(x, params))
    assert out.shape == (batch, IMG_DIM)
    assert out.dtype == jnp.bfloat16

    # Reference in plain JAX mirroring the kernel numerics (bf16 MXU inputs,
    # f32 accumulation) — same forward-pass semantics as the PyTorch module.
    xb = x.astype(jnp.bfloat16)
    w1b = w1.astype(jnp.bfloat16)
    w2b = w2.astype(jnp.bfloat16)
    h_ref = jnp.dot(xb, w1b, preferred_element_type=jnp.float32) + b1
    h_ref = jnp.where(h_ref >= 0.0, h_ref, 0.1 * h_ref)
    o_ref = jnp.dot(h_ref.astype(jnp.bfloat16), w2b,
                    preferred_element_type=jnp.float32) + b2
    ref = jnp.tanh(o_ref)
    err = float(jnp.max(jnp.abs(out.astype(jnp.float32) - ref)))
    assert err < 1e-2, err  # extra slack for the bf16 output cast

    print("KERNEL_OK")
</pallas_src>

<mosaic_0001>
module attributes {stable_mosaic.version = 11 : i64} {
  func.func @_generator_kernel(%arg0: i32, %arg1: memref<8x64xbf16, #tpu.memory_space<vmem>>, %arg2: memref<64x256xbf16, #tpu.memory_space<vmem>>, %arg3: memref<1x256xf32, #tpu.memory_space<vmem>>, %arg4: memref<256x896xbf16, #tpu.memory_space<vmem>>, %arg5: memref<1x896xf32, #tpu.memory_space<vmem>>, %arg6: memref<8x896xbf16, #tpu.memory_space<vmem>>) attributes {dimension_semantics = [#tpu.dimension_semantics<parallel>], iteration_bounds = array<i64: 1>, scalar_prefetch = 0 : i64, scratch_operands = 0 : i64, tpu.core_type = #tpu.core_type<tc>, window_params = [{transform_indices = @transform_0, window_bounds = array<i64: 8, 64>}, {pipeline_mode = #tpu.pipeline_mode<synchronous>, transform_indices = @transform_1, window_bounds = array<i64: 64, 256>}, {pipeline_mode = #tpu.pipeline_mode<synchronous>, transform_indices = @transform_2, window_bounds = array<i64: 1, 256>}, {pipeline_mode = #tpu.pipeline_mode<synchronous>, transform_indices = @transform_3, window_bounds = array<i64: 256, 896>}, {pipeline_mode = #tpu.pipeline_mode<synchronous>, transform_indices = @transform_4, window_bounds = array<i64: 1, 896>}, {transform_indices = @transform_5, window_bounds = array<i64: 8, 896>}]} {
    %c0 = arith.constant 0 : index
    %c0_0 = arith.constant 0 : index
    %0 = vector.load %arg1[%c0, %c0_0] : memref<8x64xbf16, #tpu.memory_space<vmem>>, vector<8x64xbf16>
    %c0_1 = arith.constant 0 : index
    %c0_2 = arith.constant 0 : index
    %1 = vector.load %arg2[%c0_1, %c0_2] : memref<64x256xbf16, #tpu.memory_space<vmem>>, vector<64x256xbf16>
    %cst = arith.constant dense<0.000000e+00> : vector<8x256xf32>
    %2 = tpu.matmul %0, %1, %cst {dimension_numbers = #tpu.dot_dimension_numbers<[1], [0], [0], [1], [0, 0, 1, 1], [], []>} : vector<8x64xbf16>, vector<64x256xbf16>, vector<8x256xf32> -> vector<8x256xf32>
    %c0_3 = arith.constant 0 : index
    %c0_4 = arith.constant 0 : index
    %3 = vector.load %arg3[%c0_3, %c0_4] : memref<1x256xf32, #tpu.memory_space<vmem>>, vector<1x256xf32>
    %4 = vector.broadcast %3 : vector<1x256xf32> to vector<8x256xf32>
    %5 = arith.addf %2, %4 : vector<8x256xf32>
    %cst_5 = arith.constant 0.000000e+00 : f32
    %6 = vector.broadcast %cst_5 : f32 to vector<8x256xf32>
    %7 = arith.cmpf oge, %5, %6 : vector<8x256xf32>
    %cst_6 = arith.constant 1.000000e-01 : f32
    %8 = vector.broadcast %cst_6 : f32 to vector<8x256xf32>
    %9 = arith.mulf %8, %5 : vector<8x256xf32>
    %10 = arith.select %7, %5, %9 : vector<8x256xi1>, vector<8x256xf32>
    %11 = arith.truncf %10 : vector<8x256xf32> to vector<8x256xbf16>
    %c0_7 = arith.constant 0 : index
    %c0_8 = arith.constant 0 : index
    %12 = vector.load %arg4[%c0_7, %c0_8] : memref<256x896xbf16, #tpu.memory_space<vmem>>, vector<256x896xbf16>
    %cst_9 = arith.constant dense<0.000000e+00> : vector<8x896xf32>
    %13 = tpu.matmul %11, %12, %cst_9 {dimension_numbers = #tpu.dot_dimension_numbers<[1], [0], [0], [1], [0, 0, 1, 1], [], []>} : vector<8x256xbf16>, vector<256x896xbf16>, vector<8x896xf32> -> vector<8x896xf32>
    %c0_10 = arith.constant 0 : index
    %c0_11 = arith.constant 0 : index
    %14 = vector.load %arg5[%c0_10, %c0_11] : memref<1x896xf32, #tpu.memory_space<vmem>>, vector<1x896xf32>
    %15 = vector.broadcast %14 : vector<1x896xf32> to vector<8x896xf32>
    %16 = arith.addf %13, %15 : vector<8x896xf32>
    %17 = math.tanh %16 : vector<8x896xf32>
    %18 = arith.truncf %17 : vector<8x896xf32> to vector<8x896xbf16>
    %c0_12 = arith.constant 0 : index
    %c0_13 = arith.constant 0 : index
    %19 = vector.load %arg6[%c0_12, %c0_13] : memref<8x896xbf16, #tpu.memory_space<vmem>>, vector<8x896xbf16>
    tpu.vector_store %arg6[%c0_12, %c0_13], %18 {strides = array<i32>} : memref<8x896xbf16, #tpu.memory_space<vmem>>, vector<8x896xbf16>,
    return
  }
  func.func @transform_0(%arg0: i32) -> (i32, i32) {
    %c0_i32 = arith.constant 0 : i32
    %c0_i32_0 = arith.constant 0 : i32
    return %arg0, %c0_i32 : i32, i32
  }
  func.func @transform_1(%arg0: i32) -> (i32, i32) {
    %c0_i32 = arith.constant 0 : i32
    %c0_i32_0 = arith.constant 0 : i32
    %c0_i32_1 = arith.constant 0 : i32
    return %c0_i32, %c0_i32_0 : i32, i32
  }
  func.func @transform_2(%arg0: i32) -> (i32, i32) {
    %c0_i32 = arith.constant 0 : i32
    %c0_i32_0 = arith.constant 0 : i32
    %c0_i32_1 = arith.constant 0 : i32
    return %c0_i32, %c0_i32_0 : i32, i32
  }
  func.func @transform_3(%arg0: i32) -> (i32, i32) {
    %c0_i32 = arith.constant 0 : i32
    %c0_i32_0 = arith.constant 0 : i32
    %c0_i32_1 = arith.constant 0 : i32
    return %c0_i32, %c0_i32_0 : i32, i32
  }
  func.func @transform_4(%arg0: i32) -> (i32, i32) {
    %c0_i32 = arith.constant 0 : i32
    %c0_i32_0 = arith.constant 0 : i32
    %c0_i32_1 = arith.constant 0 : i32
    return %c0_i32, %c0_i32_0 : i32, i32
  }
  func.func @transform_5(%arg0: i32) -> (i32, i32) {
    %c0_i32 = arith.constant 0 : i32
    %c0_i32_0 = arith.constant 0 : i32
    return %arg0, %c0_i32 : i32, i32
  }
}

</mosaic_0001>

<bundles_post_ra>
// kernel: generator_forward.1
= control target key start
LH: loop header
LB: loop body
LE: loop exit
PB: predicated region body
PF: predicated region fallthrough
CT: control target
= control target key end

     0   :  { %10 = vsyncpa [#allocation3], 0  ;;  %s1867_s0 = inlined_call_operand.vmem [shape: bf16[8,64], index: 0, kind: input, shape index: {}]   ;;  %s1868_s1 = inlined_call_operand.hbm [shape: bf16[64,256], index: 1, kind: input, shape index: {}]   ;;  %s1869_s2 = inlined_call_operand.vmem [shape: f32[1,256], index: 2, kind: input, shape index: {}]   ;;  %s1870_s3 = inlined_call_operand.hbm [shape: bf16[256,896], index: 3, kind: input, shape index: {}]   ;;  %s1871_s4 = inlined_call_operand.vmem [shape: f32[1,896], index: 4, kind: input, shape index: {}]   ;;  %s1872_s5 = inlined_call_operand.hbm [shape: bf16[8,896], index: 5, kind: output, shape index: {}]  }
   0x1   :  { %11 = vsyncpa [#allocation6], 0 }
   0x2   :  { %12 = vsyncpa [#allocation4], 0  ;;  %s19_s20 = sshll.u32 %s1868_s1, 4  ;;  %s1783_s21 = smov [#allocation2]   ;;  %s20_s20 = int_to_ptr.hbm [resolvable:$true] %s19_s20 }
   0x3   :  { %s21_s22 = sshll.u32 %s1783_s21, 4  ;;  %s34_s25 = sshll.u32 %s1870_s3, 4  ;;  %s22_s22 = int_to_ptr.vmem [resolvable:$true] %s21_s22  ;;  %s35_s25 = int_to_ptr.hbm [resolvable:$true] %s34_s25 }
   0x4   :  { %s1784_s26 = smov 128   ;;  %s1785_s27 = smov 8  }
   0x5   :  { %27 = dma.hbm_to_vmem [thread:$0]  %s20_s20, 1024, %s22_s22, [#allocation3], %s1784_s26, %s1784_s26, %s1785_s27  }
   0x6   :  { %s1786_s28 = smov [#allocation5]   ;;  %s1787_s30 = smov 448  }
   0x7   :  { %s36_s29 = sshll.u32 %s1786_s28, 4  ;;  %s1788_s6 = smov 28   ;;  %s37_s29 = int_to_ptr.vmem [resolvable:$true] %s36_s29 }
   0x8   :  { %42 = dma.hbm_to_vmem [thread:$0]  %s35_s25, 14336, %s37_s29, [#allocation6], %s1787_s30, %s1787_s30, %s1788_s6  }
   0x9   :  { %1777 = dma.done.wait [#allocation3], 1024  }
   0xa   :  { %1778 = vsyncadd [#allocation3], 4294966272 }
   0xb   :  { %1779 = dma.done.wait [#allocation6], 14336  }
   0xc   :  { %1780 = vsyncadd [#allocation6], 4294952960  ;;  %v1108_v0 = vld [vmem:[#allocation2 + $0x30] sm:$0xf]  ;;  %v1571_v1 = vld [vmem:[#allocation2 + $0x34] sm:$0xf0] }
   0xd   :  { %v1570_v2 = vld [vmem:[#allocation2 + $0x34] sm:$0xf]  ;;  %v1109_v3 = vor.u32 %v1571_v1, %v1108_v0  ;;  %v1110_v4 = vld [vmem:[#allocation2 + $0x38] sm:$0xf0]  ;;  %v1100_v5 = vld [vmem:[#allocation2 + $0x20] sm:$0xf] }
   0xe   :  { %v1569_v6 = vld [vmem:[#allocation2 + $0x24] sm:$0xf0]  ;;  %v1113_v7 = vor.u32 %v1570_v2, %v1110_v4  ;;  %v1568_v8 = vld [vmem:[#allocation2 + $0x24] sm:$0xf]  ;;  %v1102_v9 = vld [vmem:[#allocation2 + $0x28] sm:$0xf0] }
   0xf   :  { %117 = vmatpush.bf16.msra.mxu0 %v1109_v3  ;;  %v1101_v10 = vor.u32 %v1569_v6, %v1100_v5  ;;  %v1105_v11 = vor.u32 %v1568_v8, %v1102_v9  ;;  %v1092_v12 = vld [vmem:[#allocation2 + $0x10] sm:$0xf]  ;;  %v1567_v13 = vld [vmem:[#allocation2 + $0x14] sm:$0xf0]  ;;  %v1566_v14 = vld [vmem:[#allocation2 + $0x14] sm:$0xf] }
  0x10   :  { %130 = vmatpush.bf16.msra.mxu1 %v1113_v7  ;;  %v1094_v15 = vld [vmem:[#allocation2 + $0x18] sm:$0xf0]  ;;  %v1314_v16 = vld [vmem:[#allocation5 + $0x188] sm:$0xf]  ;;  %v1084_v17 = vld [vmem:[#allocation2] sm:$0xf]  ;;  %v1093_v21 = vor.u32 %v1567_v13, %v1092_v12 }
  0x11   :  { %v1624_v18 = vld [vmem:[#allocation5 + $0x1a0] sm:$0xf0]  ;;  %v1538_v19 = vld [vmem:[#allocation5 + $0x348] sm:$0xf]  ;;  %v1086_v24 = vld [vmem:[#allocation2 + $0x8] sm:$0xf0]  ;;  %v1097_v27 = vor.u32 %v1566_v14, %v1094_v15 }
  0x12   :  { %v1680_v20 = vld [vmem:[#allocation5 + $0x360] sm:$0xf0]  ;;  %v1565_v22 = vld [vmem:[#allocation2 + $0x4] sm:$0xf0]  ;;  %v1315_v25 = vor.u32 %v1624_v18, %v1314_v16  ;;  %v1621_v28 = vld [vmem:[#allocation5 + $0x18c] sm:$0xf] }
  0x13   :  { %118 = vmatpush.bf16.msra.mxu0 %v1101_v10  ;;  %v1564_v23 = vld [vmem:[#allocation2 + $0x4] sm:$0xf]  ;;  %v1539_v26 = vor.u32 %v1680_v20, %v1538_v19  ;;  %v1286_v29 = vld [vmem:[#allocation5 + $0x150] sm:$0xf]  ;;  %v1617_v30 = vld [vmem:[#allocation5 + $0x168] sm:$0xf0]  ;;  %v1085_v38 = vor.u32 %v1565_v22, %v1084_v17 }
  0x14   :  { %131 = vmatpush.bf16.msra.mxu1 %v1105_v11  ;;  %867 = vmatpush.bf16.msra.mxu2 %v1315_v25  ;;  %v1316_v31 = vld [vmem:[#allocation5 + $0x1a4] sm:$0xf0]  ;;  %v1287_v32 = vor.u32 %v1617_v30, %v1286_v29  ;;  %v1510_v33 = vld [vmem:[#allocation5 + $0x310] sm:$0xf]  ;;  %v1673_v34 = vld [vmem:[#allocation5 + $0x328] sm:$0xf0]  ;;  %v1089_v42 = vor.u32 %v1564_v23, %v1086_v24 }
  0x15   :  { %880 = vmatpush.bf16.msra.mxu3 %v1539_v26  ;;  %v1677_v35 = vld [vmem:[#allocation5 + $0x34c] sm:$0xf]  ;;  %v1540_v36 = vld [vmem:[#allocation5 + $0x364] sm:$0xf0]  ;;  %v1511_v37 = vor.u32 %v1673_v34, %v1510_v33  ;;  %v1258_v39 = vld [vmem:[#allocation5 + $0x118] sm:$0xf]  ;;  %v1319_v43 = vor.u32 %v1621_v28, %v1316_v31 }
  0x16   :  { %v1610_v40 = vld [vmem:[#allocation5 + $0x130] sm:$0xf0]  ;;  %v1482_v41 = vld [vmem:[#allocation5 + $0x2d8] sm:$0xf]  ;;  %vm109_vm0 = vcmask 523264   ;;  %v1543_v45 = vor.u32 %v1677_v35, %v1540_v36  ;;  %s1071_s12 = sshll.u32 %s1872_s5, 4  ;;  %s1072_s12 = int_to_ptr.hbm [resolvable:$true] %s1071_s12 }
  0x17   :  { %119 = vmatpush.bf16.msra.mxu0 %v1093_v21  ;;  %v1666_v44 = vld [vmem:[#allocation5 + $0x2f0] sm:$0xf0]  ;;  %v1288_v47 = vld [vmem:[#allocation5 + $0x16c] sm:$0xf0]  ;;  %v1259_v49 = vor.u32 %v1610_v40, %v1258_v39  ;;  %v1230_v52 = vld [vmem:[#allocation5 + $0xe0] sm:$0xf] }
  0x18   :  { %132 = vmatpush.bf16.msra.mxu1 %v1097_v27  ;;  %868 = vmatpush.bf16.msra.mxu2 %v1287_v32  ;;  %v1614_v46 = vld [vmem:[#allocation5 + $0x154] sm:$0xf]  ;;  %v1512_v50 = vld [vmem:[#allocation5 + $0x32c] sm:$0xf0]  ;;  %v1483_v51 = vor.u32 %v1666_v44, %v1482_v41  ;;  %v1603_v53 = vld [vmem:[#allocation5 + $0xf8] sm:$0xf0] }
  0x19   :  { %881 = vmatpush.bf16.msra.mxu3 %v1511_v37  ;;  %v1670_v48 = vld [vmem:[#allocation5 + $0x314] sm:$0xf]  ;;  %v54_v54 = vld [vmem:[%s1867_s0] sm:$0xf]  ;;  %v1659_v56 = vld [vmem:[#allocation5 + $0x2b8] sm:$0xf0]  ;;  %v1291_v57 = vor.u32 %v1614_v46, %v1288_v47  ;;  %v1231_v62 = vor.u32 %v1603_v53, %v1230_v52 }
  0x1a   :  { %v1454_v55 = vld [vmem:[#allocation5 + $0x2a0] sm:$0xf]  ;;  %v1515_v58 = vor.u32 %v1670_v48, %v1512_v50  ;;  %v1607_v59 = vld [vmem:[#allocation5 + $0x11c] sm:$0xf]  ;;  %v1260_v60 = vld [vmem:[#allocation5 + $0x134] sm:$0xf0] }
  0x1b   :  { %120 = vmatpush.bf16.msra.mxu0 %v1085_v38  ;;  %v1663_v61 = vld [vmem:[#allocation5 + $0x2dc] sm:$0xf]  ;;  %v1484_v63 = vld [vmem:[#allocation5 + $0x2f4] sm:$0xf0]  ;;  %v1455_v0 = vor.u32 %v1659_v56, %v1454_v55  ;;  %v1202_v1 = vld [vmem:[#allocation5 + $0xa8] sm:$0xf]  ;;  %v1263_v5 = vor.u32 %v1607_v59, %v1260_v60 }
  0x1c   :  { %133 = vmatpush.bf16.msra.mxu1 %v1089_v42  ;;  %869 = vmatpush.bf16.msra.mxu2 %v1259_v49  ;;  %v1596_v2 = vld [vmem:[#allocation5 + $0xc0] sm:$0xf0]  ;;  %v1426_v3 = vld [vmem:[#allocation5 + $0x268] sm:$0xf]  ;;  %v1487_v6 = vor.u32 %v1663_v61, %v1484_v63  ;;  %v1232_v8 = vld [vmem:[#allocation5 + $0xfc] sm:$0xf0] }
  0x1d   :  { %882 = vmatpush.bf16.msra.mxu3 %v1483_v51  ;;  %v1652_v4 = vld [vmem:[#allocation5 + $0x280] sm:$0xf0]  ;;  %v1203_v10 = vor.u32 %v1596_v2, %v1202_v1  ;;  %v1456_v11 = vld [vmem:[#allocation5 + $0x2bc] sm:$0xf0]  ;;  %v1174_v13 = vld [vmem:[#allocation5 + $0x70] sm:$0xf] }
  0x1e   :  { %1114 = vmatmul.msk.bf16.vlgmr.msra.gmra.mxu0 %vm109_vm0, %v54_v54  ;;  %v1600_v7 = vld [vmem:[#allocation5 + $0xe4] sm:$0xf]  ;;  %v1427_v12 = vor.u32 %v1652_v4, %v1426_v3  ;;  %v1589_v14 = vld [vmem:[#allocation5 + $0x88] sm:$0xf0]  ;;  %v1398_v15 = vld [vmem:[#allocation5 + $0x230] sm:$0xf] }
  0x1f   :  { %893 = vmatpush.bf16.msrb.mxu0 %v1319_v43  ;;  %1115 = vmatmul.msk.bf16.vlgmr.msra.gmra.mxu1 %vm109_vm0, %v54_v54  ;;  %v1656_v9 = vld [vmem:[#allocation5 + $0x2a4] sm:$0xf]  ;;  %v1645_v16 = vld [vmem:[#allocation5 + $0x248] sm:$0xf0]  ;;  %v1235_v17 = vor.u32 %v1600_v7, %v1232_v8  ;;  %v1204_v20 = vld [vmem:[#allocation5 + $0xc4] sm:$0xf0]  ;;  %v1175_v22 = vor.u32 %v1589_v14, %v1174_v13 }
  0x20   :  { %906 = vmatpush.bf16.msrb.mxu1 %v1543_v45  ;;  %870 = vmatpush.bf16.msra.mxu2 %v1231_v62  ;;  %v1459_v18 = vor.u32 %v1656_v9, %v1456_v11  ;;  %v1593_v19 = vld [vmem:[#allocation5 + $0xac] sm:$0xf]  ;;  %v1428_v23 = vld [vmem:[#allocation5 + $0x284] sm:$0xf0]  ;;  %v1399_v24 = vor.u32 %v1645_v16, %v1398_v15  ;;  %v1146_v25 = vld [vmem:[#allocation5 + $0x38] sm:$0xf] }
  0x21   :  { %883 = vmatpush.bf16.msra.mxu3 %v1455_v0  ;;  %v1649_v21 = vld [vmem:[#allocation5 + $0x26c] sm:$0xf]  ;;  %v1582_v26 = vld [vmem:[#allocation5 + $0x50] sm:$0xf0]  ;;  %v1370_v27 = vld [vmem:[#allocation5 + $0x1f8] sm:$0xf]  ;;  %v1207_v29 = vor.u32 %v1593_v19, %v1204_v20 }
  0x22   :  { %v1638_v28 = vld [vmem:[#allocation5 + $0x210] sm:$0xf0]  ;;  %v1431_v31 = vor.u32 %v1649_v21, %v1428_v23  ;;  %v1176_v32 = vld [vmem:[#allocation5 + $0x8c] sm:$0xf0]  ;;  %v1147_v35 = vor.u32 %v1582_v26, %v1146_v25  ;;  %v1118_v37 = vld [vmem:[#allocation5] sm:$0xf] }
  0x23   :  { %894 = vmatpush.bf16.msrb.mxu0 %v1291_v57  ;;  %v1586_v30 = vld [vmem:[#allocation5 + $0x74] sm:$0xf]  ;;  %v1400_v34 = vld [vmem:[#allocation5 + $0x24c] sm:$0xf0]  ;;  %v1371_v36 = vor.u32 %v1638_v28, %v1370_v27  ;;  %v1575_v38 = vld [vmem:[#allocation5 + $0x18] sm:$0xf0] }
  0x24   :  { %907 = vmatpush.bf16.msrb.mxu1 %v1515_v58  ;;  %871 = vmatpush.bf16.msra.mxu2 %v1203_v10  ;;  %v1642_v33 = vld [vmem:[#allocation5 + $0x234] sm:$0xf]  ;;  %v1342_v39 = vld [vmem:[#allocation5 + $0x1c0] sm:$0xf]  ;;  %v1631_v40 = vld [vmem:[#allocation5 + $0x1d8] sm:$0xf0]  ;;  %v1179_v43 = vor.u32 %v1586_v30, %v1176_v32  ;;  %v1119_v49 = vor.u32 %v1575_v38, %v1118_v37 }
  0x25   :  { %884 = vmatpush.bf16.msra.mxu3 %v1427_v12  ;;  %v1322_v41 = vld [vmem:[#allocation5 + $0x190] sm:$0xf]  ;;  %v1625_v42 = vld [vmem:[#allocation5 + $0x1a8] sm:$0xf0]  ;;  %v1403_v46 = vor.u32 %v1642_v33, %v1400_v34  ;;  %v1579_v47 = vld [vmem:[#allocation5 + $0x3c] sm:$0xf]  ;;  %v1343_v52 = vor.u32 %v1631_v40, %v1342_v39 }
  0x26   :  { %v1546_v44 = vld [vmem:[#allocation5 + $0x350] sm:$0xf]  ;;  %v1681_v45 = vld [vmem:[#allocation5 + $0x368] sm:$0xf0]  ;;  %v1148_v48 = vld [vmem:[#allocation5 + $0x54] sm:$0xf0]  ;;  %v1323_v53 = vor.u32 %v1625_v42, %v1322_v41 }
  0x27   :  { %895 = vmatpush.bf16.msrb.mxu0 %v1263_v5  ;;  %v1635_v50 = vld [vmem:[#allocation5 + $0x1fc] sm:$0xf]  ;;  %v1372_v51 = vld [vmem:[#allocation5 + $0x214] sm:$0xf0]  ;;  %v1547_v54 = vor.u32 %v1681_v45, %v1546_v44  ;;  %v1618_v56 = vld [vmem:[#allocation5 + $0x170] sm:$0xf0]  ;;  %v1151_v57 = vor.u32 %v1579_v47, %v1148_v48 }
  0x28   :  { %908 = vmatpush.bf16.msrb.mxu1 %v1487_v6  ;;  %872 = vmatpush.bf16.msra.mxu2 %v1175_v22  ;;  %v1294_v55 = vld [vmem:[#allocation5 + $0x158] sm:$0xf]  ;;  %v1572_v58 = vld [vmem:[#allocation5 + $0x4] sm:$0xf]  ;;  %v1674_v60 = vld [vmem:[#allocation5 + $0x330] sm:$0xf0]  ;;  %v1375_v61 = vor.u32 %v1635_v50, %v1372_v51 }
  0x29   :  { %885 = vmatpush.bf16.msra.mxu3 %v1399_v24  ;;  %v1518_v59 = vld [vmem:[#allocation5 + $0x318] sm:$0xf]  ;;  %v1120_v62 = vld [vmem:[#allocation5 + $0x1c] sm:$0xf0]  ;;  %v1628_v63 = vld [vmem:[#allocation5 + $0x1c4] sm:$0xf]  ;;  %v1295_v4 = vor.u32 %v1618_v56, %v1294_v55 }
  0x2a   :  { %v1344_v0 = vld [vmem:[#allocation5 + $0x1dc] sm:$0xf0]  ;;  %v1622_v1 = vld [vmem:[#allocation5 + $0x194] sm:$0xf]  ;;  %v1324_v2 = vld [vmem:[#allocation5 + $0x1ac] sm:$0xf0]  ;;  %v1519_v6 = vor.u32 %v1674_v60, %v1518_v59  ;;  %v1123_v9 = vor.u32 %v1572_v58, %v1120_v62 }
  0x2b   :  { %896 = vmatpush.bf16.msrb.mxu0 %v1235_v17  ;;  %v1678_v3 = vld [vmem:[#allocation5 + $0x354] sm:$0xf]  ;;  %v1548_v5 = vld [vmem:[#allocation5 + $0x36c] sm:$0xf0]  ;;  %v1266_v7 = vld [vmem:[#allocation5 + $0x120] sm:$0xf]  ;;  %v1347_v12 = vor.u32 %v1628_v63, %v1344_v0  ;;  %v1327_v13 = vor.u32 %v1622_v1, %v1324_v2 }
  0x2c   :  { %909 = vmatpush.bf16.msrb.mxu1 %v1459_v18  ;;  %873 = vmatpush.bf16.msra.mxu2 %v1147_v35  ;;  %v1611_v8 = vld [vmem:[#allocation5 + $0x138] sm:$0xf0]  ;;  %v1490_v10 = vld [vmem:[#allocation5 + $0x2e0] sm:$0xf]  ;;  %v1551_v14 = vor.u32 %v1678_v3, %v1548_v5  ;;  %v1296_v16 = vld [vmem:[#allocation5 + $0x174] sm:$0xf0] }
  0x2d   :  { %886 = vmatpush.bf16.msra.mxu3 %v1371_v36  ;;  %v1667_v11 = vld [vmem:[#allocation5 + $0x2f8] sm:$0xf0]  ;;  %v1267_v18 = vor.u32 %v1611_v8, %v1266_v7  ;;  %v1520_v19 = vld [vmem:[#allocation5 + $0x334] sm:$0xf0]  ;;  %v1238_v21 = vld [vmem:[#allocation5 + $0xe8] sm:$0xf] }
  0x2e   :  { %v1615_v15 = vld [vmem:[#allocation5 + $0x15c] sm:$0xf]  ;;  %v1491_v20 = vor.u32 %v1667_v11, %v1490_v10  ;;  %v1604_v22 = vld [vmem:[#allocation5 + $0x100] sm:$0xf0]  ;;  %v1462_v23 = vld [vmem:[#allocation5 + $0x2a8] sm:$0xf] }
  0x2f   :  { %897 = vmatpush.bf16.msrb.mxu0 %v1207_v29  ;;  %v1671_v17 = vld [vmem:[#allocation5 + $0x31c] sm:$0xf]  ;;  %v1660_v24 = vld [vmem:[#allocation5 + $0x2c0] sm:$0xf0]  ;;  %v1299_v25 = vor.u32 %v1615_v15, %v1296_v16  ;;  %v1268_v28 = vld [vmem:[#allocation5 + $0x13c] sm:$0xf0]  ;;  %v1239_v30 = vor.u32 %v1604_v22, %v1238_v21 }
  0x30   :  { %910 = vmatpush.bf16.msrb.mxu1 %v1431_v31  ;;  %874 = vmatpush.bf16.msra.mxu2 %v1119_v49  ;;  %v1523_v26 = vor.u32 %v1671_v17, %v1520_v19  ;;  %v1608_v27 = vld [vmem:[#allocation5 + $0x124] sm:$0xf]  ;;  %v1492_v31 = vld [vmem:[#allocation5 + $0x2fc] sm:$0xf0]  ;;  %v1463_v32 = vor.u32 %v1660_v24, %v1462_v23  ;;  %v1210_v33 = vld [vmem:[#allocation5 + $0xb0] sm:$0xf] }
  0x31   :  { %887 = vmatpush.bf16.msra.mxu3 %v1343_v52  ;;  %v1664_v29 = vld [vmem:[#allocation5 + $0x2e4] sm:$0xf]  ;;  %v1597_v34 = vld [vmem:[#allocation5 + $0xc8] sm:$0xf0]  ;;  %v1434_v35 = vld [vmem:[#allocation5 + $0x270] sm:$0xf]  ;;  %v1271_v37 = vor.u32 %v1608_v27, %v1268_v28 }
  0x32   :  { %v1653_v36 = vld [vmem:[#allocation5 + $0x288] sm:$0xf0]  ;;  %v1495_v38 = vor.u32 %v1664_v29, %v1492_v31  ;;  %v1240_v40 = vld [vmem:[#allocation5 + $0x104] sm:$0xf0]  ;;  %v1211_v42 = vor.u32 %v1597_v34, %v1210_v33  ;;  %v1182_v45 = vld [vmem:[#allocation5 + $0x78] sm:$0xf] }
  0x33   :  { %898 = vmatpush.bf16.msrb.mxu0 %v1179_v43  ;;  %v1601_v39 = vld [vmem:[#allocation5 + $0xec] sm:$0xf]  ;;  %v1464_v43 = vld [vmem:[#allocation5 + $0x2c4] sm:$0xf0]  ;;  %v1435_v44 = vor.u32 %v1653_v36, %v1434_v35  ;;  %v1406_v47 = vld [vmem:[#allocation5 + $0x238] sm:$0xf] }
  0x34   :  { %911 = vmatpush.bf16.msrb.mxu1 %v1403_v46  ;;  %919 = vmatpush.bf16.msrb.mxu2 %v1323_v53  ;;  %v1657_v41 = vld [vmem:[#allocation5 + $0x2ac] sm:$0xf]  ;;  %v1590_v46 = vld [vmem:[#allocation5 + $0x90] sm:$0xf0]  ;;  %v1243_v49 = vor.u32 %v1601_v39, %v1240_v40  ;;  %v1212_v52 = vld [vmem:[#allocation5 + $0xcc] sm:$0xf0] }
  0x35   :  { %932 = vmatpush.bf16.msrb.mxu3 %v1547_v54  ;;  %v1646_v48 = vld [vmem:[#allocation5 + $0x250] sm:$0xf0]  ;;  %v1467_v50 = vor.u32 %v1657_v41, %v1464_v43  ;;  %v1183_v53 = vor.u32 %v1590_v46, %v1182_v45  ;;  %v1436_v55 = vld [vmem:[#allocation5 + $0x28c] sm:$0xf0]  ;;  %v1587_v59 = vld [vmem:[#allocation5 + $0x7c] sm:$0xf] }
  0x36   :  { %v1594_v51 = vld [vmem:[#allocation5 + $0xb4] sm:$0xf]  ;;  %v1407_v56 = vor.u32 %v1646_v48, %v1406_v47  ;;  %v1184_v60 = vld [vmem:[#allocation5 + $0x94] sm:$0xf0]  ;;  %v1154_v1 = vld [vmem:[#allocation5 + $0x40] sm:$0xf] }
  0x37   :  { %899 = vmatpush.bf16.msrb.mxu0 %v1151_v57  ;;  %v1650_v54 = vld [vmem:[#allocation5 + $0x274] sm:$0xf]  ;;  %v1215_v57 = vor.u32 %v1594_v51, %v1212_v52  ;;  %v1187_v62 = vor.u32 %v1587_v59, %v1184_v60  ;;  %v1408_v63 = vld [vmem:[#allocation5 + $0x254] sm:$0xf0]  ;;  %v1583_v2 = vld [vmem:[#allocation5 + $0x58] sm:$0xf0] }
  0x38   :  { %912 = vmatpush.bf16.msrb.mxu1 %v1375_v61  ;;  %920 = vmatpush.bf16.msrb.mxu2 %v1295_v4  ;;  %v1439_v58 = vor.u32 %v1650_v54, %v1436_v55  ;;  %v1643_v61 = vld [vmem:[#allocation5 + $0x23c] sm:$0xf]  ;;  %v1378_v3 = vld [vmem:[#allocation5 + $0x200] sm:$0xf]  ;;  %v1155_v4 = vor.u32 %v1583_v2, %v1154_v1  ;;  %v1636_v10 = vld [vmem:[#allocation5 + $0x204] sm:$0xf] }
  0x39   :  { %933 = vmatpush.bf16.msrb.mxu3 %v1519_v6  ;;  %v1411_v0 = vor.u32 %v1643_v61, %v1408_v63  ;;  %v1639_v5 = vld [vmem:[#allocation5 + $0x218] sm:$0xf0]  ;;  %v1580_v6 = vld [vmem:[#allocation5 + $0x44] sm:$0xf]  ;;  %v1156_v7 = vld [vmem:[#allocation5 + $0x5c] sm:$0xf0] }
  0x3a   :  { %v1379_v8 = vor.u32 %v1639_v5, %v1378_v3  ;;  %v1380_v11 = vld [vmem:[#allocation5 + $0x21c] sm:$0xf0]  ;;  %v1350_v15 = vld [vmem:[#allocation5 + $0x1c8] sm:$0xf]  ;;  %v1632_v17 = vld [vmem:[#allocation5 + $0x1e0] sm:$0xf0] }
  0x3b   :  { %900 = vmatpush.bf16.msrb.mxu0 %v1123_v9  ;;  %v1159_v9 = vor.u32 %v1580_v6, %v1156_v7  ;;  %v1128_v19 = vld [vmem:[#allocation5 + $0x24] sm:$0xf0]  ;;  %v1629_v22 = vld [vmem:[#allocation5 + $0x1cc] sm:$0xf]  ;;  %v1330_v31 = vld [vmem:[#allocation5 + $0x198] sm:$0xf] }
  0x3c   :  { %913 = vmatpush.bf16.msrb.mxu1 %v1347_v12  ;;  %921 = vmatpush.bf16.msrb.mxu2 %v1267_v18  ;;  %v1383_v12 = vor.u32 %v1636_v10, %v1380_v11  ;;  %v1573_v18 = vld [vmem:[#allocation5 + $0xc] sm:$0xf]  ;;  %v1352_v23 = vld [vmem:[#allocation5 + $0x1e4] sm:$0xf0]  ;;  %v1554_v33 = vld [vmem:[#allocation5 + $0x358] sm:$0xf] }
  0x3d   :  { %934 = vmatpush.bf16.msrb.mxu3 %v1491_v20  ;;  %v1351_v20 = vor.u32 %v1632_v17, %v1350_v15  ;;  %v1131_v21 = vor.u32 %v1573_v18, %v1128_v19  ;;  %v1355_v24 = vor.u32 %v1629_v22, %v1352_v23  ;;  %v1682_v35 = vld [vmem:[#allocation5 + $0x370] sm:$0xf0]  ;;  %v1623_v36 = vld [vmem:[#allocation5 + $0x19c] sm:$0xf]  ;;  %v1556_v41 = vld [vmem:[#allocation5 + $0x374] sm:$0xf0] }
  0x3e   :  { %v1679_v39 = vld [vmem:[#allocation5 + $0x35c] sm:$0xf]  ;;  %v1555_v46 = vor.u32 %v1682_v35, %v1554_v33  ;;  %v1302_v47 = vld [vmem:[#allocation5 + $0x160] sm:$0xf]  ;;  %v1616_v54 = vld [vmem:[#allocation5 + $0x164] sm:$0xf] }
  0x3f   :  { %945 = vmatpush.bf16.msra.mxu0 %v1327_v13  ;;  %v1126_v13 = vld [vmem:[#allocation5 + $0x8] sm:$0xf]  ;;  %v1619_v48 = vld [vmem:[#allocation5 + $0x178] sm:$0xf0]  ;;  %v1559_v51 = vor.u32 %v1679_v39, %v1556_v41  ;;  %v1526_v52 = vld [vmem:[#allocation5 + $0x320] sm:$0xf] }
  0x40   :  { %958 = vmatpush.bf16.msra.mxu1 %v1551_v14  ;;  %922 = vmatpush.bf16.msrb.mxu2 %v1239_v30  ;;  %v1576_v14 = vld [vmem:[#allocation5 + $0x20] sm:$0xf0]  ;;  %v1303_v60 = vor.u32 %v1619_v48, %v1302_v47  ;;  %v1498_v2 = vld [vmem:[#allocation5 + $0x2e8] sm:$0xf]  ;;  %v1665_v6 = vld [vmem:[#allocation5 + $0x2ec] sm:$0xf] }
  0x41   :  { %935 = vmatpush.bf16.msrb.mxu3 %v1463_v32  ;;  %v1127_v16 = vor.u32 %v1576_v14, %v1126_v13  ;;  %v1626_v32 = vld [vmem:[#allocation5 + $0x1b0] sm:$0xf0]  ;;  %v1612_v63 = vld [vmem:[#allocation5 + $0x140] sm:$0xf0]  ;;  %v1276_v5 = vld [vmem:[#allocation5 + $0x144] sm:$0xf0] }
  0x42   :  { %v1331_v45 = vor.u32 %v1626_v32, %v1330_v31  ;;  %v1668_v3 = vld [vmem:[#allocation5 + $0x300] sm:$0xf0]  ;;  %v1500_v7 = vld [vmem:[#allocation5 + $0x304] sm:$0xf0]  ;;  %v1246_v10 = vld [vmem:[#allocation5 + $0xf0] sm:$0xf] }
  0x43   :  { %946 = vmatpush.bf16.msra.mxu0 %v1299_v25  ;;  %v63_v25 = vld [vmem:[%s1869_s2] sm:$0x3]  ;;  %v1605_v11 = vld [vmem:[#allocation5 + $0x108] sm:$0xf0]  ;;  %v1503_v13 = vor.u32 %v1665_v6, %v1500_v7  ;;  %v1470_v14 = vld [vmem:[#allocation5 + $0x2b0] sm:$0xf] }
  0x44   :  { %959 = vmatpush.bf16.msra.mxu1 %v1523_v26  ;;  %923 = vmatpush.bf16.msrb.mxu2 %v1211_v42  ;;  %v65_v26 = vperm.slane %v63_v25, 0  ;;  %v66_v27 = vperm.slane %v63_v25, 1  ;;  %v1661_v15 = vld [vmem:[#allocation5 + $0x2c8] sm:$0xf0]  ;;  %v1248_v17 = vld [vmem:[#allocation5 + $0x10c] sm:$0xf0] }
  0x45   :  { %936 = vmatpush.bf16.msrb.mxu3 %v1435_v44  ;;  %v1658_v18 = vld [vmem:[#allocation5 + $0x2b4] sm:$0xf]  ;;  %v1472_v19 = vld [vmem:[#allocation5 + $0x2cc] sm:$0xf0]  ;;  %v1218_v22 = vld [vmem:[#allocation5 + $0xb8] sm:$0xf] }
  0x46   :  { %v1598_v23 = vld [vmem:[#allocation5 + $0xd0] sm:$0xf0]  ;;  %v1475_v25 = vor.u32 %v1658_v18, %v1472_v19  ;;  %v1444_v31 = vld [vmem:[#allocation5 + $0x294] sm:$0xf0]  ;;  %v1591_v35 = vld [vmem:[#allocation5 + $0x98] sm:$0xf0] }
  0x47   :  { %947 = vmatpush.bf16.msra.mxu0 %v1271_v37  ;;  %v1332_v37 = vld [vmem:[#allocation5 + $0x1b4] sm:$0xf0]  ;;  %v1219_v32 = vor.u32 %v1598_v23, %v1218_v22  ;;  %v1647_v39 = vld [vmem:[#allocation5 + $0x258] sm:$0xf0]  ;;  %v1192_v41 = vld [vmem:[#allocation5 + $0x9c] sm:$0xf0] }
  0x48   :  { %960 = vmatpush.bf16.msra.mxu1 %v1495_v38  ;;  %924 = vmatpush.bf16.msrb.mxu2 %v1183_v53  ;;  %v1675_v53 = vld [vmem:[#allocation5 + $0x338] sm:$0xf0]  ;;  %v1162_v47 = vld [vmem:[#allocation5 + $0x48] sm:$0xf]  ;;  %v1584_v48 = vld [vmem:[#allocation5 + $0x60] sm:$0xf0] }
  0x49   :  { %937 = vmatpush.bf16.msrb.mxu3 %v1407_v56  ;;  %v1304_v56 = vld [vmem:[#allocation5 + $0x17c] sm:$0xf0]  ;;  %v1527_v61 = vor.u32 %v1675_v53, %v1526_v52  ;;  %v1386_v52 = vld [vmem:[#allocation5 + $0x208] sm:$0xf]  ;;  %v1640_v53 = vld [vmem:[#allocation5 + $0x220] sm:$0xf0] }
  0x4a   :  { %v1338_v6 = vld [vmem:[#allocation5 + $0x1a0] sm:$0xf]  ;;  %v1627_v7 = vld [vmem:[#allocation5 + $0x1b8] sm:$0xf0]  ;;  %v1534_v18 = vld [vmem:[#allocation5 + $0x328] sm:$0xf] }
  0x4b   :  { %948 = vmatpush.bf16.msra.mxu0 %v1243_v49  ;;  %v1676_v19 = vld [vmem:[#allocation5 + $0x340] sm:$0xf0]  ;;  %v1282_v22 = vld [vmem:[#allocation5 + $0x130] sm:$0xf]  ;;  %v1613_v23 = vld [vmem:[#allocation5 + $0x148] sm:$0xf0] }
  0x4c   :  { %961 = vmatpush.bf16.msra.mxu1 %v1467_v50  ;;  %925 = vmatpush.bf16.msrb.mxu2 %v1155_v4  ;;  %v1335_v50 = vor.u32 %v1623_v36, %v1332_v37  ;;  %v1609_v4 = vld [vmem:[#allocation5 + $0x12c] sm:$0xf] }
  0x4d   :  { %938 = vmatpush.bf16.msrb.mxu3 %v1379_v8 }
  0x4f   :  { %949 = vmatpush.bf16.msra.mxu0 %v1215_v57  ;;  %v1672_v57 = vld [vmem:[#allocation5 + $0x324] sm:$0xf] }
  0x50   :  { %962 = vmatpush.bf16.msra.mxu1 %v1439_v58  ;;  %926 = vmatpush.bf16.msrb.mxu2 %v1127_v16  ;;  %v1528_v58 = vld [vmem:[#allocation5 + $0x33c] sm:$0xf0]  ;;  %v1602_v16 = vld [vmem:[#allocation5 + $0xf4] sm:$0xf] }
  0x51   :  { %939 = vmatpush.bf16.msrb.mxu3 %v1351_v20  ;;  %v1531_v1 = vor.u32 %v1672_v57, %v1528_v58  ;;  %v1247_v20 = vor.u32 %v1605_v11, %v1246_v10  ;;  %v1388_v57 = vld [vmem:[#allocation5 + $0x224] sm:$0xf0]  ;;  %v1163_v58 = vor.u32 %v1584_v48, %v1162_v47  ;;  %v1170_v47 = vld [vmem:[#allocation5 + $0x50] sm:$0xf]  ;;  %v1585_v48 = vld [vmem:[#allocation5 + $0x68] sm:$0xf0] }
  0x53   :  { %950 = vmatpush.bf16.msra.mxu0 %v1187_v62  ;;  %v1274_v62 = vld [vmem:[#allocation5 + $0x128] sm:$0xf] }
  0x54   :  { %963 = vmatpush.bf16.msra.mxu1 %v1411_v0  ;;  %v1307_v0 = vor.u32 %v1616_v54, %v1304_v56  ;;  %v1275_v8 = vor.u32 %v1612_v63, %v1274_v62  ;;  %v1581_v54 = vld [vmem:[#allocation5 + $0x4c] sm:$0xf]  ;;  %v1358_v62 = vld [vmem:[#allocation5 + $0x1d0] sm:$0xf] }
  0x55   :  { %v1637_v56 = vld [vmem:[#allocation5 + $0x20c] sm:$0xf] }
  0x57   :  { %951 = vmatpush.bf16.msra.mxu0 %v1159_v9  ;;  %v1499_v9 = vor.u32 %v1668_v3, %v1498_v2  ;;  %v1574_v2 = vld [vmem:[#allocation5 + $0x14] sm:$0xf]  ;;  %v1136_v3 = vld [vmem:[#allocation5 + $0x2c] sm:$0xf0] }
  0x58   :  { %964 = vmatpush.bf16.msra.mxu1 %v1383_v12  ;;  %v1279_v12 = vor.u32 %v1609_v4, %v1276_v5  ;;  %v1630_v4 = vld [vmem:[#allocation5 + $0x1d4] sm:$0xf]  ;;  %v1360_v5 = vld [vmem:[#allocation5 + $0x1ec] sm:$0xf0] }
  0x5b   :  { %952 = vmatpush.bf16.msra.mxu0 %v1131_v21  ;;  %v1471_v21 = vor.u32 %v1661_v15, %v1470_v14  ;;  %v1339_v14 = vor.u32 %v1627_v7, %v1338_v6 }
  0x5c   :  { %965 = vmatpush.bf16.msra.mxu1 %v1355_v24  ;;  %v1251_v24 = vor.u32 %v1602_v16, %v1248_v17  ;;  %v1310_v16 = vld [vmem:[#allocation5 + $0x168] sm:$0xf]  ;;  %v1620_v17 = vld [vmem:[#allocation5 + $0x180] sm:$0xf0] }
  0x9b   :  { %v122_v28 = vpop.f32.mrf.mxu0 }
  0x9c   :  { %v123_v29 = vadd.f32 %v122_v28, %v65_v26  ;;  %v135_v30 = vpop.f32.mrf.mxu1  ;;  %v1442_v26 = vld [vmem:[#allocation5 + $0x278] sm:$0xf]  ;;  %v1595_v28 = vld [vmem:[#allocation5 + $0xbc] sm:$0xf] }
  0x9d   :  { %v136_v34 = vadd.f32 %v135_v30, %v66_v27  ;;  %v1654_v27 = vld [vmem:[#allocation5 + $0x290] sm:$0xf0]  ;;  %v1651_v30 = vld [vmem:[#allocation5 + $0x27c] sm:$0xf] }
  0x9e   :  { %vm139_vm1 = vcmp.ge.f32.partialorder %v123_v29, 0.0  ;;  %v141_v38 = vmul.f32 0.1, %v123_v29  ;;  %v1443_v33 = vor.u32 %v1654_v27, %v1442_v26  ;;  %v1447_v37 = vor.u32 %v1651_v30, %v1444_v31  ;;  %v1478_v30 = vld [vmem:[#allocation5 + $0x2b8] sm:$0xf] }
  0x9f   :  { %vm140_vm2 = vcmp.ge.f32.partialorder %v136_v34, 0.0  ;;  %v142_v40 = vmul.f32 0.1, %v136_v34  ;;  %v1283_v26 = vor.u32 %v1613_v23, %v1282_v22  ;;  %v1662_v31 = vld [vmem:[#allocation5 + $0x2d0] sm:$0xf0] }
  0xa0   :  { %v143_v42 = vsel %vm139_vm1, %v123_v29, %v141_v38  ;;  %v1220_v29 = vld [vmem:[#allocation5 + $0xd4] sm:$0xf0]  ;;  %v1414_v38 = vld [vmem:[#allocation5 + $0x240] sm:$0xf] }
  0xa1   :  { %v1834_v43 = vpack.c.bf16 %v143_v42, %v143_v42  ;;  %v144_v44 = vsel %vm140_vm2, %v136_v34, %v142_v40  ;;  %v1190_v34 = vld [vmem:[#allocation5 + $0x80] sm:$0xf]  ;;  %v1223_v36 = vor.u32 %v1595_v28, %v1220_v29  ;;  %v1588_v40 = vld [vmem:[#allocation5 + $0x84] sm:$0xf]  ;;  %v1254_v28 = vld [vmem:[#allocation5 + $0xf8] sm:$0xf] }
  0xa2   :  { %v1836_v49 = vpack.c.bf16 %v144_v44, %v144_v44  ;;  %v1644_v42 = vld [vmem:[#allocation5 + $0x244] sm:$0xf]  ;;  %v1416_v44 = vld [vmem:[#allocation5 + $0x25c] sm:$0xf0]  ;;  %v1606_v29 = vld [vmem:[#allocation5 + $0x110] sm:$0xf0] }
  0xa3   :  { %v124_v55 = vpop.f32.mrf.mxu0  ;;  %875 = vmatmul.bf16.vlgmr.msra.gmra.mxu2 %v1834_v43  ;;  %901 = vmatmul.bf16.vlgmr.msrb.gmra.mxu0 %v1834_v43 }
  0xa4   :  { %v137_v59 = vpop.f32.mrf.mxu1  ;;  %888 = vmatmul.bf16.vlgmr.msra.gmra.mxu3 %v1836_v49  ;;  %914 = vmatmul.bf16.vlgmr.msrb.gmra.mxu1 %v1836_v49  ;;  %v1164_v55 = vld [vmem:[#allocation5 + $0x64] sm:$0xf0] }
  0xa5   :  { %971 = vmatpush.bf16.msra.mxu2 %v1331_v45  ;;  %984 = vmatpush.bf16.msra.mxu3 %v1555_v46  ;;  %v1191_v45 = vor.u32 %v1591_v35, %v1190_v34  ;;  %v1415_v46 = vor.u32 %v1647_v39, %v1414_v38  ;;  %v1387_v59 = vor.u32 %v1640_v53, %v1386_v52  ;;  %v1226_v34 = vld [vmem:[#allocation5 + $0xc0] sm:$0xf]  ;;  %v1599_v35 = vld [vmem:[#allocation5 + $0xd8] sm:$0xf0] }
  0xa6   :  { %997 = vmatpush.bf16.msrb.mxu0 %v1335_v50  ;;  %1010 = vmatpush.bf16.msrb.mxu1 %v1559_v51  ;;  %v1195_v50 = vor.u32 %v1588_v40, %v1192_v41  ;;  %v1419_v51 = vor.u32 %v1644_v42, %v1416_v44  ;;  %v1167_v63 = vor.u32 %v1581_v54, %v1164_v55  ;;  %v1198_v40 = vld [vmem:[#allocation5 + $0x88] sm:$0xf]  ;;  %v1592_v41 = vld [vmem:[#allocation5 + $0xa0] sm:$0xf0]  ;;  %v1142_v54 = vld [vmem:[#allocation5 + $0x18] sm:$0xf] }
  0xa7   :  { %v1227_v38 = vor.u32 %v1599_v35, %v1226_v34  ;;  %v1422_v42 = vld [vmem:[#allocation5 + $0x248] sm:$0xf]  ;;  %v1648_v44 = vld [vmem:[#allocation5 + $0x260] sm:$0xf0]  ;;  %v1171_v52 = vor.u32 %v1585_v48, %v1170_v47  ;;  %v1578_v55 = vld [vmem:[#allocation5 + $0x30] sm:$0xf0] }
  0xa9   :  { %972 = vmatpush.bf16.msra.mxu2 %v1303_v60  ;;  %985 = vmatpush.bf16.msra.mxu3 %v1527_v61  ;;  %v1134_v60 = vld [vmem:[#allocation5 + $0x10] sm:$0xf]  ;;  %v1577_v61 = vld [vmem:[#allocation5 + $0x28] sm:$0xf0] }
  0xaa   :  { %998 = vmatpush.bf16.msrb.mxu0 %v1307_v0  ;;  %1011 = vmatpush.bf16.msrb.mxu1 %v1531_v1  ;;  %v1391_v0 = vor.u32 %v1637_v56, %v1388_v57  ;;  %v1633_v1 = vld [vmem:[#allocation5 + $0x1e8] sm:$0xf0]  ;;  %v1135_v10 = vor.u32 %v1577_v61, %v1134_v60  ;;  %v1366_v56 = vld [vmem:[#allocation5 + $0x1d8] sm:$0xf]  ;;  %v1634_v57 = vld [vmem:[#allocation5 + $0x1f0] sm:$0xf0] }
  0xab   :  { %v1359_v11 = vor.u32 %v1633_v1, %v1358_v62  ;;  %v1855_v60 = vld [vmem:[%s1871_s4] sm:$0xff]  ;;  %s1789_s4 = smov [#allocation7]  }
  0xac   :  { %v278_v61 = vperm.slane %v1855_v60, 1  ;;  %v277_v1 = vperm.slane %v1855_v60, 0  ;;  %v283_v47 = vperm.slane %v1855_v60, 6  ;;  %s1069_s9 = sshll.u32 %s1789_s4, 4  ;;  %s1070_s9 = int_to_ptr.vmem [resolvable:$true] %s1069_s9 }
  0xad   :  { %973 = vmatpush.bf16.msra.mxu2 %v1275_v8  ;;  %986 = vmatpush.bf16.msra.mxu3 %v1499_v9  ;;  %v1562_v8 = vld [vmem:[#allocation5 + $0x360] sm:$0xf]  ;;  %v1683_v9 = vld [vmem:[#allocation5 + $0x378] sm:$0xf0] }
  0xae   :  { %999 = vmatpush.bf16.msrb.mxu0 %v1279_v12  ;;  %1012 = vmatpush.bf16.msrb.mxu1 %v1503_v13  ;;  %v1139_v12 = vor.u32 %v1574_v2, %v1136_v3  ;;  %v1363_v13 = vor.u32 %v1630_v4, %v1360_v5  ;;  %v1563_v15 = vor.u32 %v1683_v9, %v1562_v8  ;;  %v280_v8 = vperm.slane %v1855_v60, 3 }
  0xb1   :  { %974 = vmatpush.bf16.msra.mxu2 %v1247_v20  ;;  %987 = vmatpush.bf16.msra.mxu3 %v1471_v21  ;;  %v1311_v20 = vor.u32 %v1620_v17, %v1310_v16  ;;  %v1535_v21 = vor.u32 %v1676_v19, %v1534_v18  ;;  %v279_v16 = vperm.slane %v1855_v60, 2 }
  0xb2   :  { %1000 = vmatpush.bf16.msrb.mxu0 %v1251_v24  ;;  %1013 = vmatpush.bf16.msrb.mxu1 %v1475_v25  ;;  %v1506_v24 = vld [vmem:[#allocation5 + $0x2f0] sm:$0xf]  ;;  %v1669_v25 = vld [vmem:[#allocation5 + $0x308] sm:$0xf0] }
  0xb3   :  { %927 = vmatmul.bf16.vlgmr.msrb.gmra.mxu2 %v1834_v43  ;;  %953 = vmatmul.bf16.vlgmr.msra.gmra.mxu0 %v1834_v43  ;;  %v1507_v27 = vor.u32 %v1669_v25, %v1506_v24 }
  0xb4   :  { %940 = vmatmul.bf16.vlgmr.msrb.gmra.mxu3 %v1836_v49  ;;  %966 = vmatmul.bf16.vlgmr.msra.gmra.mxu1 %v1836_v49 }
  0xb5   :  { %975 = vmatpush.bf16.msra.mxu2 %v1219_v32  ;;  %988 = vmatpush.bf16.msra.mxu3 %v1443_v33  ;;  %v1255_v32 = vor.u32 %v1606_v29, %v1254_v28  ;;  %v1479_v33 = vor.u32 %v1662_v31, %v1478_v30 }
  0xb6   :  { %1001 = vmatpush.bf16.msrb.mxu0 %v1223_v36  ;;  %1014 = vmatpush.bf16.msrb.mxu1 %v1447_v37  ;;  %v1450_v36 = vld [vmem:[#allocation5 + $0x280] sm:$0xf]  ;;  %v1655_v37 = vld [vmem:[#allocation5 + $0x298] sm:$0xf0] }
  0xb7   :  { %v1451_v39 = vor.u32 %v1655_v37, %v1450_v36 }
  0xb9   :  { %976 = vmatpush.bf16.msra.mxu2 %v1191_v45  ;;  %989 = vmatpush.bf16.msra.mxu3 %v1415_v46  ;;  %v1199_v45 = vor.u32 %v1592_v41, %v1198_v40  ;;  %v1423_v46 = vor.u32 %v1648_v44, %v1422_v42 }
  0xba   :  { %1002 = vmatpush.bf16.msrb.mxu0 %v1195_v50  ;;  %1015 = vmatpush.bf16.msrb.mxu1 %v1419_v51  ;;  %v1394_v50 = vld [vmem:[#allocation5 + $0x210] sm:$0xf]  ;;  %v1641_v51 = vld [vmem:[#allocation5 + $0x228] sm:$0xf0] }
  0xbb   :  { %v1395_v53 = vor.u32 %v1641_v51, %v1394_v50 }
  0xbd   :  { %977 = vmatpush.bf16.msra.mxu2 %v1163_v58  ;;  %990 = vmatpush.bf16.msra.mxu3 %v1387_v59  ;;  %v1143_v58 = vor.u32 %v1578_v55, %v1142_v54  ;;  %v1367_v59 = vor.u32 %v1634_v57, %v1366_v56 }
  0xbe   :  { %1003 = vmatpush.bf16.msrb.mxu0 %v1167_v63  ;;  %1016 = vmatpush.bf16.msrb.mxu1 %v1391_v0 }
  0xc1   :  { %978 = vmatpush.bf16.msra.mxu2 %v1135_v10  ;;  %991 = vmatpush.bf16.msra.mxu3 %v1359_v11 }
  0xc2   :  { %1004 = vmatpush.bf16.msrb.mxu0 %v1139_v12  ;;  %1017 = vmatpush.bf16.msrb.mxu1 %v1363_v13 }
  0xc4   :  { %979 = vmatmul.bf16.vlgmr.msra.gmra.mxu2 %v1834_v43  ;;  %992 = vmatmul.bf16.vlgmr.msra.gmra.mxu3 %v1836_v49 }
  0xc5   :  { %1023 = vmatpush.bf16.msrb.mxu2 %v1339_v14  ;;  %1036 = vmatpush.bf16.msrb.mxu3 %v1563_v15 }
  0xc6   :  { %1005 = vmatmul.bf16.vlgmr.msrb.gmra.mxu0 %v1834_v43  ;;  %1018 = vmatmul.bf16.vlgmr.msrb.gmra.mxu1 %v1836_v49 }
  0xc9   :  { %1024 = vmatpush.bf16.msrb.mxu2 %v1311_v20  ;;  %1037 = vmatpush.bf16.msrb.mxu3 %v1535_v21 }
  0xcd   :  { %1025 = vmatpush.bf16.msrb.mxu2 %v1283_v26  ;;  %1038 = vmatpush.bf16.msrb.mxu3 %v1507_v27  ;;  %v282_v26 = vperm.slane %v1855_v60, 5 }
  0xd1   :  { %1026 = vmatpush.bf16.msrb.mxu2 %v1255_v32  ;;  %1039 = vmatpush.bf16.msrb.mxu3 %v1479_v33  ;;  %v281_v33 = vperm.slane %v1855_v60, 4 }
  0xd5   :  { %1027 = vmatpush.bf16.msrb.mxu2 %v1227_v38  ;;  %1040 = vmatpush.bf16.msrb.mxu3 %v1451_v39 }
  0xd9   :  { %1028 = vmatpush.bf16.msrb.mxu2 %v1199_v45  ;;  %1041 = vmatpush.bf16.msrb.mxu3 %v1423_v46 }
  0xdd   :  { %1029 = vmatpush.bf16.msrb.mxu2 %v1171_v52  ;;  %1042 = vmatpush.bf16.msrb.mxu3 %v1395_v53 }
  0xe1   :  { %1030 = vmatpush.bf16.msrb.mxu2 %v1143_v58  ;;  %1043 = vmatpush.bf16.msrb.mxu3 %v1367_v59 }
  0xe4   :  { %1031 = vmatmul.bf16.vlgmr.msrb.gmra.mxu2 %v1834_v43  ;;  %1044 = vmatmul.bf16.vlgmr.msrb.gmra.mxu3 %v1836_v49 }
 0x120   :  { %v902_v62 = vpop.f32.mrf.mxu0 }
 0x121   :  { %v915_v63 = vpop.f32.mrf.mxu1  ;;  %v903_v0 = vadd.f32 %v902_v62, %v278_v61 }
 0x123   :  { %v916_v2 = vadd.f32 %v915_v63, %v903_v0 }
 0x125   :  { %1691 = vtanh.f32 %v916_v2 }
 0x126   :  { %v876_v3 = vpop.f32.mrf.mxu2 }
 0x127   :  { %v877_v4 = vadd.f32 %v876_v3, %v277_v1  ;;  %v889_v5 = vpop.f32.mrf.mxu3 }
 0x128   :  { %v904_v6 = vpop.f32.mrf.mxu0 }
 0x129   :  { %v890_v43 = vadd.f32 %v889_v5, %v877_v4  ;;  %v917_v7 = vpop.f32.mrf.mxu1 }
 0x12b   :  { %1693 = vtanh.f32 %v890_v43  ;;  %v1692_v10 = vpop.eup %1691 }
 0x12e   :  { %v878_v49 = vpop.f32.mrf.mxu2 }
 0x12f   :  { %v891_v9 = vpop.f32.mrf.mxu3 }
 0x130   :  { %v954_v11 = vpop.f32.mrf.mxu0 }
 0x131   :  { %v1694_v12 = vpop.eup %1693  ;;  %v967_v13 = vpop.f32.mrf.mxu1  ;;  %v955_v15 = vadd.f32 %v954_v11, %v280_v8 }
 0x132   :  { %v1056_v14 = vpack.c.bf16 %v1692_v10, %v1694_v12 }
 0x133   :  { %v968_v17 = vadd.f32 %v967_v13, %v955_v15 }
 0x134   :  { %1060 = vst [vmem:[#allocation7] sm:$0xff] %v1056_v14 }
 0x135   :  { %1695 = vtanh.f32 %v968_v17 }
 0x136   :  { %v928_v18 = vpop.f32.mrf.mxu2 }
 0x137   :  { %v929_v19 = vadd.f32 %v928_v18, %v279_v16  ;;  %v941_v20 = vpop.f32.mrf.mxu3 }
 0x138   :  { %v956_v21 = vpop.f32.mrf.mxu0 }
 0x139   :  { %v942_v22 = vadd.f32 %v941_v20, %v929_v19  ;;  %v969_v23 = vpop.f32.mrf.mxu1 }
 0x13b   :  { %1697 = vtanh.f32 %v942_v22  ;;  %v1696_v27 = vpop.eup %1695 }
 0x13e   :  { %v930_v24 = vpop.f32.mrf.mxu2 }
 0x13f   :  { %v943_v25 = vpop.f32.mrf.mxu3 }
 0x141   :  { %v1698_v28 = vpop.eup %1697 }
 0x142   :  { %v1057_v29 = vpack.c.bf16 %v1696_v27, %v1698_v28 }
 0x143   :  { %v1006_v30 = vpop.f32.mrf.mxu0  ;;  %v1019_v31 = vpop.f32.mrf.mxu1 }
 0x144   :  { %v1007_v32 = vadd.f32 %v1006_v30, %v282_v26  ;;  %1061 = vst [vmem:[#allocation7 + $0x8] sm:$0xff] %v1057_v29 }
 0x146   :  { %v1020_v34 = vadd.f32 %v1019_v31, %v1007_v32 }
 0x147   :  { %v980_v35 = vpop.f32.mrf.mxu2  ;;  %v993_v36 = vpop.f32.mrf.mxu3 }
 0x148   :  { %v981_v37 = vadd.f32 %v980_v35, %v281_v33  ;;  %1699 = vtanh.f32 %v1020_v34 }
 0x14a   :  { %v994_v38 = vadd.f32 %v993_v36, %v981_v37 }
 0x14b   :  { %v1008_v39 = vpop.f32.mrf.mxu0  ;;  %v1021_v40 = vpop.f32.mrf.mxu1 }
 0x14c   :  { %1701 = vtanh.f32 %v994_v38 }
 0x14e   :  { %v1700_v44 = vpop.eup %1699 }
 0x14f   :  { %v982_v41 = vpop.f32.mrf.mxu2  ;;  %v995_v42 = vpop.f32.mrf.mxu3 }
 0x152   :  { %v1702_v45 = vpop.eup %1701 }
 0x153   :  { %v1058_v46 = vpack.c.bf16 %v1700_v44, %v1702_v45 }
 0x155   :  { %1062 = vst [vmem:[#allocation7 + $0x10] sm:$0xff] %v1058_v46 }
 0x167   :  { %v1032_v48 = vpop.f32.mrf.mxu2  ;;  %v1045_v50 = vpop.f32.mrf.mxu3 }
 0x168   :  { %v1033_v51 = vadd.f32 %v1032_v48, %v283_v47 }
 0x16a   :  { %v1046_v52 = vadd.f32 %v1045_v50, %v1033_v51 }
 0x16c   :  { %1703 = vtanh.f32 %v1046_v52 }
 0x16f   :  { %v1034_v53 = vpop.f32.mrf.mxu2  ;;  %v1047_v54 = vpop.f32.mrf.mxu3 }
 0x172   :  { %v1704_v55 = vpop.eup %1703 }
 0x173   :  { %v1059_v56 = vpack.c.bf16 %v1704_v55, %v1704_v55 }
 0x175   :  { %1063 = vst [vmem:[#allocation7 + $0x18] sm:$0xf] %v1059_v56 }
 0x176   :  { %1074 = dma.vmem_to_hbm [thread:$0]  %s1070_s9, 448, %s1072_s12, [#allocation4]  }
 0x177   :  { %1781 = dma.done.wait [#allocation4], 448  }
 0x178   :  { %1782 = vsyncadd [#allocation4], 4294966848 }
 0x179   :  { %1079 = vsyncpa [#allocation3], 1 }
 0x17a   :  { %1080 = vsyncpa [#allocation6], 1 }
 0x17b   :  { %1081 = vsyncpa [#allocation4], 1 }

</bundles_post_ra>
